<compile_context>
chip_gen: v6e
topology: v6e:2x2x1
jax: 0.10.0
libtpu: 0.0.40
codegen_flags: <defaults>
</compile_context>

<pallas_src>
import functools

import jax
import jax.numpy as jnp
from jax.experimental import pallas as pl
from jax.experimental.pallas import tpu as pltpu

_LANE = 128
_EPS = 1e-5


def _round_up(v, m):
    return ((v + m - 1) // m) * m


def _pad_axis(a, axis, target):
    pad = target - a.shape[axis]
    if pad <= 0:
        return a
    widths = [(0, 0)] * a.ndim
    widths[axis] = (0, pad)
    return jnp.pad(a, widths)


# --------------------------------------------------------------------------- kernels
def _gcn_layer1_kernel(adj_ref, x_ref, w1_ref, b1_ref, h1_ref, stats_ref):
    """Per row-tile: h1 = (A_tile @ x) @ W1 + b1, plus partial sums for BatchNorm."""
    # Reordered aggregation: contract over F (< H) first (perf review item 1).
    ax = jnp.dot(adj_ref[...], x_ref[...],
                 preferred_element_type=jnp.float32)                 # [tm, Fp] f32
    h = jnp.dot(ax.astype(w1_ref.dtype), w1_ref[...],
                preferred_element_type=jnp.float32) + b1_ref[...]    # [tm, Hp] f32
    h1_ref[...] = h

    # Per-tile partial sums for GLOBAL BatchNorm stats (reduced outside the kernel).
    hp = h.shape[1]
    s1 = jnp.sum(h, axis=0, keepdims=True)                           # [1, Hp]
    s2 = jnp.sum(h * h, axis=0, keepdims=True)                       # [1, Hp]
    pad = jnp.zeros((6, hp), jnp.float32)                            # pad to 8 sublanes
    stats_ref[...] = jnp.concatenate([s1, s2, pad], axis=0)[None]    # [1, 8, Hp]


def _gcn_layer2_kernel(adj_ref, h1_ref, mean_ref, var_ref, g_ref, beta_ref,
                       w2_ref, b2_ref, o_ref):
    """Per row-tile: BatchNorm(global stats) -> ReLU -> (A_tile @ hn) @ W2 + b2."""
    # BatchNorm1d, training-mode global batch statistics, f32 element-wise path.
    hn = (h1_ref[...] - mean_ref[...]) * jax.lax.rsqrt(var_ref[...] + _EPS)
    hn = hn * g_ref[...] + beta_ref[...]
    hn = jnp.maximum(hn, 0.0)                                        # ReLU
    # Dropout(p=0.0): identity.

    # Layer 2: (A_tile @ hn) @ W2 — avoids recomputing hn @ W2 for every row tile
    # (lane-padded Hp == Cp makes this the cheaper order under row tiling).
    ah = jnp.dot(adj_ref[...], hn.astype(adj_ref.dtype),
                 preferred_element_type=jnp.float32)                 # [tm, Hp] f32
    o_ref[...] = jnp.dot(ah.astype(w2_ref.dtype), w2_ref[...],
                         preferred_element_type=jnp.float32) + b2_ref[...]


# --------------------------------------------------------------------------- wrapper
def _choose_row_tile(n):
    for cand in (512, 256, 128, 64, 32, 16, 8):
        if cand <= n and n % cand == 0 and n // cand >= 2:
            return cand
    return n  # single full-extent block (exempt from the (8,128) rule)


@functools.partial(jax.jit, static_argnames=("row_tile",))
def simple_gcn_forward(x, adj_norm, w1, b1, gamma, beta, w2, b2, *, row_tile=None):
    n, f = x.shape
    h = w1.shape[1]
    c = w2.shape[1]
    fp, hp, cp = _round_up(f, _LANE), _round_up(h, _LANE), _round_up(c, _LANE)

    if row_tile is None:
        row_tile = _choose_row_tile(n)
    assert n % row_tile == 0
    num_tiles = n // row_tile

    # bf16 MXU operands, f32 accumulation (entries of A_hat are O(1), drift negligible).
    mxu = jnp.bfloat16
    adj_b = adj_norm.astype(mxu)                                     # [N, N]
    x_p = _pad_axis(x, 1, fp).astype(mxu)                            # [N, Fp]
    w1_p = _pad_axis(_pad_axis(w1, 0, fp), 1, hp).astype(mxu)        # [Fp, Hp]
    b1_p = _pad_axis(b1, 1, hp).astype(jnp.float32)                  # [1, Hp]
    g_p = _pad_axis(gamma, 1, hp).astype(jnp.float32)                # [1, Hp]
    be_p = _pad_axis(beta, 1, hp).astype(jnp.float32)                # [1, Hp]
    w2_p = _pad_axis(_pad_axis(w2, 0, hp), 1, cp).astype(mxu)        # [Hp, Cp]
    b2_p = _pad_axis(b2, 1, cp).astype(jnp.float32)                  # [1, Cp]

    cparams = pltpu.CompilerParams(
        dimension_semantics=("parallel",),
        vmem_limit_bytes=64 * 1024 * 1024,
    )

    # --- call 1: GCNConv 1 + per-tile BatchNorm partial sums ------------------------
    flops1 = 2 * n * n * fp + 2 * n * fp * hp + 4 * n * hp
    bytes1 = (2 * n * n + num_tiles * (2 * n * fp + 2 * fp * hp + 4 * hp)
              + 4 * n * hp + 4 * num_tiles * 8 * hp)
    h1, stats = pl.pallas_call(
        _gcn_layer1_kernel,
        out_shape=(jax.ShapeDtypeStruct((n, hp), jnp.float32),
                   jax.ShapeDtypeStruct((num_tiles, 8, hp), jnp.float32)),
        grid=(num_tiles,),
        in_specs=[
            pl.BlockSpec((row_tile, n), lambda i: (i, 0)),   # A_hat row tile
            pl.BlockSpec((n, fp), lambda i: (0, 0)),         # x (full)
            pl.BlockSpec((fp, hp), lambda i: (0, 0)),        # W1
            pl.BlockSpec((1, hp), lambda i: (0, 0)),         # b1
        ],
        out_specs=(pl.BlockSpec((row_tile, hp), lambda i: (i, 0)),
                   pl.BlockSpec((1, 8, hp), lambda i: (i, 0, 0))),
        compiler_params=cparams,
        cost_estimate=pl.CostEstimate(flops=flops1, transcendentals=0,
                                      bytes_accessed=bytes1),
    )(adj_b, x_p, w1_p, b1_p)

    # --- global BatchNorm statistics over ALL N nodes (tiny O(H) reduction) ---------
    sums = jnp.sum(stats, axis=0)                                     # [8, Hp]
    mean = sums[0:1, :] / float(n)                                    # [1, Hp]
    var = jnp.maximum(sums[1:2, :] / float(n) - mean * mean, 0.0)     # biased variance

    # --- call 2: BatchNorm + ReLU + GCNConv 2 ---------------------------------------
    flops2 = 2 * n * n * hp + 2 * n * hp * cp + num_tiles * 8 * n * hp
    bytes2 = (2 * n * n + num_tiles * (4 * n * hp + 2 * hp * cp + 4 * 4 * hp + 4 * cp)
              + 4 * n * cp)
    out_p = pl.pallas_call(
        _gcn_layer2_kernel,
        out_shape=jax.ShapeDtypeStruct((n, cp), jnp.float32),
        grid=(num_tiles,),
        in_specs=[
            pl.BlockSpec((row_tile, n), lambda i: (i, 0)),   # A_hat row tile
            pl.BlockSpec((n, hp), lambda i: (0, 0)),         # h1 (full; needed for A @ hn)
            pl.BlockSpec((1, hp), lambda i: (0, 0)),         # mean
            pl.BlockSpec((1, hp), lambda i: (0, 0)),         # var
            pl.BlockSpec((1, hp), lambda i: (0, 0)),         # gamma
            pl.BlockSpec((1, hp), lambda i: (0, 0)),         # beta
            pl.BlockSpec((hp, cp), lambda i: (0, 0)),        # W2
            pl.BlockSpec((1, cp), lambda i: (0, 0)),         # b2
        ],
        out_specs=pl.BlockSpec((row_tile, cp), lambda i: (i, 0)),
        compiler_params=cparams,
        cost_estimate=pl.CostEstimate(flops=flops2, transcendentals=num_tiles * hp,
                                      bytes_accessed=bytes2),
    )(adj_b, h1, mean, var, g_p, be_p, w2_p, b2_p)

    return out_p[:, :c]                                      # strip lane padding


# --------------------------------------------------------------------------- glue
def build_normalized_adjacency(edge_index, num_nodes):
    """Dense A_hat = D^-1/2 (A + I) D^-1/2, matching PyG GCNConv normalization.

    edge_index: int32 [2, E] with row = source, col = target. Aggregation at
    the target node, so dense A[target, source] = 1.
    """
    src = edge_index[0]
    dst = edge_index[1]
    a = jnp.zeros((num_nodes, num_nodes), jnp.float32)
    a = a.at[dst, src].add(1.0)
    a = a + jnp.eye(num_nodes, dtype=jnp.float32)            # add self-loops
    deg = jnp.sum(a, axis=1)                                 # in-degree incl. self-loop
    dinv = jnp.where(deg > 0, jax.lax.rsqrt(deg), 0.0)
    return dinv[:, None] * a * dinv[None, :]


def glorot(key, shape):
    fan_in, fan_out = shape
    limit = jnp.sqrt(6.0 / (fan_in + fan_out))
    return jax.random.uniform(key, shape, jnp.float32, -limit, limit)


if __name__ == "__main__":
    num_nodes = 16
    num_features = 8
    hidden_channels = 32
    num_classes = 4

    key = jax.random.PRNGKey(0)
    k_x, k_w1, k_w2 = jax.random.split(key, 3)

    # Node features
    x = jax.random.normal(k_x, (num_nodes, num_features), jnp.float32)

    # Deterministic graph: ring with symmetric edges -> edge_index [2, 2N]
    idx = jnp.arange(num_nodes, dtype=jnp.int32)
    nxt = (idx + 1) % num_nodes
    src = jnp.concatenate([idx, nxt])
    dst = jnp.concatenate([nxt, idx])
    edge_index = jnp.stack([src, dst])                       # [2, 32]

    adj_norm = build_normalized_adjacency(edge_index, num_nodes)

    # Parameters (PyG GCNConv: glorot weight, zero bias; BatchNorm1d: gamma=1, beta=0)
    w1 = glorot(k_w1, (num_features, hidden_channels))
    b1 = jnp.zeros((1, hidden_channels), jnp.float32)
    w2 = glorot(k_w2, (hidden_channels, num_classes))
    b2 = jnp.zeros((1, num_classes), jnp.float32)
    gamma = jnp.ones((1, hidden_channels), jnp.float32)
    beta = jnp.zeros((1, hidden_channels), jnp.float32)

    out = simple_gcn_forward(x, adj_norm, w1, b1, gamma, beta, w2, b2)
    jax.block_until_ready(out)

    assert out.shape == (num_nodes, num_classes)
    assert out.dtype == jnp.float32
    assert bool(jnp.all(jnp.isfinite(out)))
    print("KERNEL_OK")
</pallas_src>

<mosaic_0001>
module attributes {stable_mosaic.version = 11 : i64} {
  func.func @_gcn_layer1_kernel(%arg0: i32, %arg1: memref<8x16xbf16, #tpu.memory_space<vmem>>, %arg2: memref<16x128xbf16, #tpu.memory_space<vmem>>, %arg3: memref<128x128xbf16, #tpu.memory_space<vmem>>, %arg4: memref<1x128xf32, #tpu.memory_space<vmem>>, %arg5: memref<8x128xf32, #tpu.memory_space<vmem>>, %arg6: memref<1x8x128xf32, #tpu.memory_space<vmem>>) attributes {dimension_semantics = [#tpu.dimension_semantics<parallel>], iteration_bounds = array<i64: 2>, scalar_prefetch = 0 : i64, scratch_operands = 0 : i64, tpu.core_type = #tpu.core_type<tc>, window_params = [{transform_indices = @transform_0, window_bounds = array<i64: 8, 16>}, {pipeline_mode = #tpu.pipeline_mode<synchronous>, transform_indices = @transform_1, window_bounds = array<i64: 16, 128>}, {pipeline_mode = #tpu.pipeline_mode<synchronous>, transform_indices = @transform_2, window_bounds = array<i64: 128, 128>}, {pipeline_mode = #tpu.pipeline_mode<synchronous>, transform_indices = @transform_3, window_bounds = array<i64: 1, 128>}, {transform_indices = @transform_4, window_bounds = array<i64: 8, 128>}, {transform_indices = @transform_5, window_bounds = array<i64: 1, 8, 128>}]} {
    %c0 = arith.constant 0 : index
    %c0_0 = arith.constant 0 : index
    %0 = vector.load %arg1[%c0, %c0_0] : memref<8x16xbf16, #tpu.memory_space<vmem>>, vector<8x16xbf16>
    %c0_1 = arith.constant 0 : index
    %c0_2 = arith.constant 0 : index
    %1 = vector.load %arg2[%c0_1, %c0_2] : memref<16x128xbf16, #tpu.memory_space<vmem>>, vector<16x128xbf16>
    %cst = arith.constant dense<0.000000e+00> : vector<8x128xf32>
    %2 = tpu.matmul %0, %1, %cst {dimension_numbers = #tpu.dot_dimension_numbers<[1], [0], [0], [1], [0, 0, 1, 1], [], []>} : vector<8x16xbf16>, vector<16x128xbf16>, vector<8x128xf32> -> vector<8x128xf32>
    %3 = arith.truncf %2 : vector<8x128xf32> to vector<8x128xbf16>
    %c0_3 = arith.constant 0 : index
    %c0_4 = arith.constant 0 : index
    %4 = vector.load %arg3[%c0_3, %c0_4] : memref<128x128xbf16, #tpu.memory_space<vmem>>, vector<128x128xbf16>
    %cst_5 = arith.constant dense<0.000000e+00> : vector<8x128xf32>
    %5 = tpu.matmul %3, %4, %cst_5 {dimension_numbers = #tpu.dot_dimension_numbers<[1], [0], [0], [1], [0, 0, 1, 1], [], []>} : vector<8x128xbf16>, vector<128x128xbf16>, vector<8x128xf32> -> vector<8x128xf32>
    %c0_6 = arith.constant 0 : index
    %c0_7 = arith.constant 0 : index
    %6 = vector.load %arg4[%c0_6, %c0_7] : memref<1x128xf32, #tpu.memory_space<vmem>>, vector<1x128xf32>
    %7 = vector.broadcast %6 : vector<1x128xf32> to vector<8x128xf32>
    %8 = arith.addf %5, %7 : vector<8x128xf32>
    %c0_8 = arith.constant 0 : index
    %c0_9 = arith.constant 0 : index
    %9 = vector.load %arg5[%c0_8, %c0_9] : memref<8x128xf32, #tpu.memory_space<vmem>>, vector<8x128xf32>
    tpu.vector_store %arg5[%c0_8, %c0_9], %8 {strides = array<i32>} : memref<8x128xf32, #tpu.memory_space<vmem>>, vector<8x128xf32>,
    %cst_10 = arith.constant dense<0.000000e+00> : vector<128xf32>
    %10 = vector.multi_reduction <add>, %8, %cst_10 [0] : vector<8x128xf32> to vector<128xf32>
    %11 = vector.shape_cast %10 : vector<128xf32> to vector<1x128xf32>
    %12 = arith.mulf %8, %8 : vector<8x128xf32>
    %cst_11 = arith.constant dense<0.000000e+00> : vector<128xf32>
    %13 = vector.multi_reduction <add>, %12, %cst_11 [0] : vector<8x128xf32> to vector<128xf32>
    %14 = vector.shape_cast %13 : vector<128xf32> to vector<1x128xf32>
    %cst_12 = arith.constant 0.000000e+00 : f32
    %15 = vector.broadcast %cst_12 : f32 to vector<6x128xf32>
    %16 = tpu.concatenate %11, %14, %15 in 0 : vector<1x128xf32>, vector<1x128xf32>, vector<6x128xf32> -> vector<8x128xf32>
    %17 = vector.shape_cast %16 : vector<8x128xf32> to vector<1x8x128xf32>
    %c0_13 = arith.constant 0 : index
    %c0_14 = arith.constant 0 : index
    %c0_15 = arith.constant 0 : index
    %18 = vector.load %arg6[%c0_13, %c0_14, %c0_15] : memref<1x8x128xf32, #tpu.memory_space<vmem>>, vector<1x8x128xf32>
    tpu.vector_store %arg6[%c0_13, %c0_14, %c0_15], %17 {strides = array<i32>} : memref<1x8x128xf32, #tpu.memory_space<vmem>>, vector<1x8x128xf32>,
    return
  }
  func.func @transform_0(%arg0: i32) -> (i32, i32) {
    %c0_i32 = arith.constant 0 : i32
    %c0_i32_0 = arith.constant 0 : i32
    return %arg0, %c0_i32 : i32, i32
  }
  func.func @transform_1(%arg0: i32) -> (i32, i32) {
    %c0_i32 = arith.constant 0 : i32
    %c0_i32_0 = arith.constant 0 : i32
    %c0_i32_1 = arith.constant 0 : i32
    return %c0_i32, %c0_i32_0 : i32, i32
  }
  func.func @transform_2(%arg0: i32) -> (i32, i32) {
    %c0_i32 = arith.constant 0 : i32
    %c0_i32_0 = arith.constant 0 : i32
    %c0_i32_1 = arith.constant 0 : i32
    return %c0_i32, %c0_i32_0 : i32, i32
  }
  func.func @transform_3(%arg0: i32) -> (i32, i32) {
    %c0_i32 = arith.constant 0 : i32
    %c0_i32_0 = arith.constant 0 : i32
    %c0_i32_1 = arith.constant 0 : i32
    return %c0_i32, %c0_i32_0 : i32, i32
  }
  func.func @transform_4(%arg0: i32) -> (i32, i32) {
    %c0_i32 = arith.constant 0 : i32
    %c0_i32_0 = arith.constant 0 : i32
    return %arg0, %c0_i32 : i32, i32
  }
  func.func @transform_5(%arg0: i32) -> (i32, i32, i32) {
    %c0_i32 = arith.constant 0 : i32
    %c0_i32_0 = arith.constant 0 : i32
    %c0_i32_1 = arith.constant 0 : i32
    return %arg0, %c0_i32, %c0_i32_0 : i32, i32, i32
  }
}

module attributes {stable_mosaic.version = 11 : i64} {
  func.func @_gcn_layer2_kernel(%arg0: i32, %arg1: memref<8x16xbf16, #tpu.memory_space<vmem>>, %arg2: memref<16x128xf32, #tpu.memory_space<vmem>>, %arg3: memref<1x128xf32, #tpu.memory_space<vmem>>, %arg4: memref<1x128xf32, #tpu.memory_space<vmem>>, %arg5: memref<1x128xf32, #tpu.memory_space<vmem>>, %arg6: memref<1x128xf32, #tpu.memory_space<vmem>>, %arg7: memref<128x128xbf16, #tpu.memory_space<vmem>>, %arg8: memref<1x128xf32, #tpu.memory_space<vmem>>, %arg9: memref<8x128xf32, #tpu.memory_space<vmem>>) attributes {dimension_semantics = [#tpu.dimension_semantics<parallel>], iteration_bounds = array<i64: 2>, scalar_prefetch = 0 : i64, scratch_operands = 0 : i64, tpu.core_type = #tpu.core_type<tc>, window_params = [{transform_indices = @transform_0, window_bounds = array<i64: 8, 16>}, {pipeline_mode = #tpu.pipeline_mode<synchronous>, transform_indices = @transform_1, window_bounds = array<i64: 16, 128>}, {pipeline_mode = #tpu.pipeline_mode<synchronous>, transform_indices = @transform_2, window_bounds = array<i64: 1, 128>}, {pipeline_mode = #tpu.pipeline_mode<synchronous>, transform_indices = @transform_3, window_bounds = array<i64: 1, 128>}, {pipeline_mode = #tpu.pipeline_mode<synchronous>, transform_indices = @transform_4, window_bounds = array<i64: 1, 128>}, {pipeline_mode = #tpu.pipeline_mode<synchronous>, transform_indices = @transform_5, window_bounds = array<i64: 1, 128>}, {pipeline_mode = #tpu.pipeline_mode<synchronous>, transform_indices = @transform_6, window_bounds = array<i64: 128, 128>}, {pipeline_mode = #tpu.pipeline_mode<synchronous>, transform_indices = @transform_7, window_bounds = array<i64: 1, 128>}, {transform_indices = @transform_8, window_bounds = array<i64: 8, 128>}]} {
    %c0 = arith.constant 0 : index
    %c0_0 = arith.constant 0 : index
    %0 = vector.load %arg2[%c0, %c0_0] : memref<16x128xf32, #tpu.memory_space<vmem>>, vector<16x128xf32>
    %c0_1 = arith.constant 0 : index
    %c0_2 = arith.constant 0 : index
    %1 = vector.load %arg3[%c0_1, %c0_2] : memref<1x128xf32, #tpu.memory_space<vmem>>, vector<1x128xf32>
    %2 = vector.broadcast %1 : vector<1x128xf32> to vector<16x128xf32>
    %3 = arith.subf %0, %2 : vector<16x128xf32>
    %c0_3 = arith.constant 0 : index
    %c0_4 = arith.constant 0 : index
    %4 = vector.load %arg4[%c0_3, %c0_4] : memref<1x128xf32, #tpu.memory_space<vmem>>, vector<1x128xf32>
    %cst = arith.constant 9.99999974E-6 : f32
    %5 = vector.broadcast %cst : f32 to vector<1x128xf32>
    %6 = arith.addf %4, %5 : vector<1x128xf32>
    %7 = math.rsqrt %6 : vector<1x128xf32>
    %8 = vector.broadcast %7 : vector<1x128xf32> to vector<16x128xf32>
    %9 = arith.mulf %3, %8 : vector<16x128xf32>
    %c0_5 = arith.constant 0 : index
    %c0_6 = arith.constant 0 : index
    %10 = vector.load %arg5[%c0_5, %c0_6] : memref<1x128xf32, #tpu.memory_space<vmem>>, vector<1x128xf32>
    %11 = vector.broadcast %10 : vector<1x128xf32> to vector<16x128xf32>
    %12 = arith.mulf %9, %11 : vector<16x128xf32>
    %c0_7 = arith.constant 0 : index
    %c0_8 = arith.constant 0 : index
    %13 = vector.load %arg6[%c0_7, %c0_8] : memref<1x128xf32, #tpu.memory_space<vmem>>, vector<1x128xf32>
    %14 = vector.broadcast %13 : vector<1x128xf32> to vector<16x128xf32>
    %15 = arith.addf %12, %14 : vector<16x128xf32>
    %cst_9 = arith.constant 0.000000e+00 : f32
    %16 = vector.broadcast %cst_9 : f32 to vector<16x128xf32>
    %17 = arith.maximumf %15, %16 : vector<16x128xf32>
    %c0_10 = arith.constant 0 : index
    %c0_11 = arith.constant 0 : index
    %18 = vector.load %arg1[%c0_10, %c0_11] : memref<8x16xbf16, #tpu.memory_space<vmem>>, vector<8x16xbf16>
    %19 = arith.truncf %17 : vector<16x128xf32> to vector<16x128xbf16>
    %cst_12 = arith.constant dense<0.000000e+00> : vector<8x128xf32>
    %20 = tpu.matmul %18, %19, %cst_12 {dimension_numbers = #tpu.dot_dimension_numbers<[1], [0], [0], [1], [0, 0, 1, 1], [], []>} : vector<8x16xbf16>, vector<16x128xbf16>, vector<8x128xf32> -> vector<8x128xf32>
    %21 = arith.truncf %20 : vector<8x128xf32> to vector<8x128xbf16>
    %c0_13 = arith.constant 0 : index
    %c0_14 = arith.constant 0 : index
    %22 = vector.load %arg7[%c0_13, %c0_14] : memref<128x128xbf16, #tpu.memory_space<vmem>>, vector<128x128xbf16>
    %cst_15 = arith.constant dense<0.000000e+00> : vector<8x128xf32>
    %23 = tpu.matmul %21, %22, %cst_15 {dimension_numbers = #tpu.dot_dimension_numbers<[1], [0], [0], [1], [0, 0, 1, 1], [], []>} : vector<8x128xbf16>, vector<128x128xbf16>, vector<8x128xf32> -> vector<8x128xf32>
    %c0_16 = arith.constant 0 : index
    %c0_17 = arith.constant 0 : index
    %24 = vector.load %arg8[%c0_16, %c0_17] : memref<1x128xf32, #tpu.memory_space<vmem>>, vector<1x128xf32>
    %25 = vector.broadcast %24 : vector<1x128xf32> to vector<8x128xf32>
    %26 = arith.addf %23, %25 : vector<8x128xf32>
    %c0_18 = arith.constant 0 : index
    %c0_19 = arith.constant 0 : index
    %27 = vector.load %arg9[%c0_18, %c0_19] : memref<8x128xf32, #tpu.memory_space<vmem>>, vector<8x128xf32>
    tpu.vector_store %arg9[%c0_18, %c0_19], %26 {strides = array<i32>} : memref<8x128xf32, #tpu.memory_space<vmem>>, vector<8x128xf32>,
    return
  }
  func.func @transform_0(%arg0: i32) -> (i32, i32) {
    %c0_i32 = arith.constant 0 : i32
    %c0_i32_0 = arith.constant 0 : i32
    return %arg0, %c0_i32 : i32, i32
  }
  func.func @transform_1(%arg0: i32) -> (i32, i32) {
    %c0_i32 = arith.constant 0 : i32
    %c0_i32_0 = arith.constant 0 : i32
    %c0_i32_1 = arith.constant 0 : i32
    return %c0_i32, %c0_i32_0 : i32, i32
  }
  func.func @transform_2(%arg0: i32) -> (i32, i32) {
    %c0_i32 = arith.constant 0 : i32
    %c0_i32_0 = arith.constant 0 : i32
    %c0_i32_1 = arith.constant 0 : i32
    return %c0_i32, %c0_i32_0 : i32, i32
  }
  func.func @transform_3(%arg0: i32) -> (i32, i32) {
    %c0_i32 = arith.constant 0 : i32
    %c0_i32_0 = arith.constant 0 : i32
    %c0_i32_1 = arith.constant 0 : i32
    return %c0_i32, %c0_i32_0 : i32, i32
  }
  func.func @transform_4(%arg0: i32) -> (i32, i32) {
    %c0_i32 = arith.constant 0 : i32
    %c0_i32_0 = arith.constant 0 : i32
    %c0_i32_1 = arith.constant 0 : i32
    return %c0_i32, %c0_i32_0 : i32, i32
  }
  func.func @transform_5(%arg0: i32) -> (i32, i32) {
    %c0_i32 = arith.constant 0 : i32
    %c0_i32_0 = arith.constant 0 : i32
    %c0_i32_1 = arith.constant 0 : i32
    return %c0_i32, %c0_i32_0 : i32, i32
  }
  func.func @transform_6(%arg0: i32) -> (i32, i32) {
    %c0_i32 = arith.constant 0 : i32
    %c0_i32_0 = arith.constant 0 : i32
    %c0_i32_1 = arith.constant 0 : i32
    return %c0_i32, %c0_i32_0 : i32, i32
  }
  func.func @transform_7(%arg0: i32) -> (i32, i32) {
    %c0_i32 = arith.constant 0 : i32
    %c0_i32_0 = arith.constant 0 : i32
    %c0_i32_1 = arith.constant 0 : i32
    return %c0_i32, %c0_i32_0 : i32, i32
  }
  func.func @transform_8(%arg0: i32) -> (i32, i32) {
    %c0_i32 = arith.constant 0 : i32
    %c0_i32_0 = arith.constant 0 : i32
    return %arg0, %c0_i32 : i32, i32
  }
}

</mosaic_0001>

<bundles_post_ra>
// kernel: simple_gcn_forward.2
= control target key start
LH: loop header
LB: loop body
LE: loop exit
PB: predicated region body
PF: predicated region fallthrough
CT: control target
= control target key end

     0   :  { %s617_s18 = smov 0   ;;  %s671_s0 = inlined_call_operand.vmem [shape: bf16[16,16], index: 0, kind: input, shape index: {}]   ;;  %s672_s1 = inlined_call_operand.vmem [shape: bf16[16,128], index: 1, kind: input, shape index: {}]   ;;  %s673_s2 = inlined_call_operand.vmem [shape: bf16[128,128], index: 2, kind: input, shape index: {}]   ;;  %s674_s3 = inlined_call_operand.vmem [shape: f32[1,128], index: 3, kind: input, shape index: {}]   ;;  %s675_s4 = inlined_call_operand.vmem [shape: f32[16,128], index: 4, kind: output, shape index: {0}]   ;;  %s676_s5 = inlined_call_operand.vmem [shape: f32[2,8,128], index: 5, kind: output, shape index: {1}]  }
   0x1 LB: > { %s500_s19 = sadd.s32 4294967295, %s583_s18   ;;  %p504_p0 = scmp.ge.s32.totalorder %s583_s18, 1  ;;  %s583_s18 = sphi %s617_s18, %s16_s18  }
   0x2   : > { %p189_p1 = scmp.lt.s32.totalorder %s583_s18, 3 }
   0x4   : > { %p190_p2 = pnand %p504_p0, %p189_p1 }
   0x5   : > { %p219_p3 = scmp.lt.s32.totalorder (!%p190_p2), %s500_s19, 1 }
   0x6   : > { %193 = sbr.rel (%p190_p2) target bundleno = 423 (0x1a7), region = 36 }
   0xb   : > { %v568_v0 = vld [vmem:[%s672_s1] sm:$0xff]   ;;  %v585_v1 = vmov 0.0   ;;  %v569_v2 = vld [vmem:[%s673_s2 + $0x38] sm:$0xff]   ;;  %vm586_vm0 = vmmov 0   ;;  %s678_s19 = smov (!%p219_p3, %s500_s19), 1  ;;  %v570_v3 = vld [vmem:[%s673_s2 + $0x30] sm:$0xff]  }
   0xc   : > { %532 = vmatprep.subr.bf16.mxu0 %v585_v1  ;;  %538 = vmatprep.subr.bf16.mxu1 %v585_v1  ;;  %s505_s26 = sshll.u32 %s678_s19, 2  ;;  %vm241_vm1 = vcmask 130048   ;;  %v571_v5 = vld [vmem:[%s673_s2 + $0x28] sm:$0xff]   ;;  %v572_v6 = vld [vmem:[%s673_s2 + $0x20] sm:$0xff]   ;;  %v573_v7 = vld [vmem:[%s673_s2 + $0x18] sm:$0xff]   ;;  %s506_s17 = sshll.u32 %s678_s19, 3 }
   0xd   : > { %533 = vmatpush3.bf16.msra.mxu0 %v568_v0  ;;  %534 = vmatprep.mubr.msk.bf16.mxu0 %vm586_vm0, %v585_v1  ;;  %s222_s29 = scalar_lea.vmem %s671_s0, %s505_s26  ;;  %v574_v8 = vld [vmem:[%s673_s2 + $0x10] sm:$0xff]   ;;  %v575_v9 = vld [vmem:[%s673_s2 + $0x8] sm:$0xff]   ;;  %v576_v10 = vld [vmem:[%s673_s2] sm:$0xff]   ;;  %s226_s24 = scalar_lea.vmem %s675_s4, %s506_s17  ;;  %vm411_vm2 = vcmask 1040384   ;;  %vm413_vm3 = vcmask 1041408  }
   0xe   : > { %539 = vmatpush3.bf16.msra.mxu1 %v569_v2  ;;  %554 = vmatprep.mubr.msk.bf16.mxu1 %vm586_vm0, %v585_v1  ;;  %v232_v4 = vld [vmem:[%s222_s29] sm:$0xf]  ;;  %s230_s26 = scalar_lea.vmem %s676_s5, %s506_s17 }
   0xf   : > { %540 = vmatprep.subr.bf16.mxu1 %v585_v1  ;;  %v510_v16 = vld [vmem:[%s674_s3] ss:$0 sm:$0xff] }
  0x10   : > { %535 = vmatmul.mubr.msk.bf16.vlgmr.msra.gmra.mxu0 %vm241_vm1, %v232_v4 }
  0x12   : > { %541 = vmatpush3.bf16.msra.mxu1 %v570_v3 }
  0x13   : > { %542 = vmatprep.subr.bf16.mxu1 %v585_v1 }
  0x16   : > { %543 = vmatpush3.bf16.msra.mxu1 %v571_v5 }
  0x17   : > { %544 = vmatprep.subr.bf16.mxu1 %v585_v1 }
  0x1a   : > { %545 = vmatpush3.bf16.msra.mxu1 %v572_v6 }
  0x1b   : > { %546 = vmatprep.subr.bf16.mxu1 %v585_v1 }
  0x1e   : > { %547 = vmatpush3.bf16.msra.mxu1 %v573_v7 }
  0x1f   : > { %548 = vmatprep.subr.bf16.mxu1 %v585_v1 }
  0x22   : > { %549 = vmatpush3.bf16.msra.mxu1 %v574_v8 }
  0x23   : > { %550 = vmatprep.subr.bf16.mxu1 %v585_v1 }
  0x26   : > { %551 = vmatpush3.bf16.msra.mxu1 %v575_v9 }
  0x27   : > { %552 = vmatprep.subr.bf16.mxu1 %v585_v1 }
  0x2a   : > { %553 = vmatpush3.bf16.msra.mxu1 %v576_v10 }
  0xd0   : > { %v279_v11 = vpop.f32.mrf.mxu0 }
  0xd1   : > { %v285_v12 = vpack.c.bf16 %v279_v11, %v279_v11 }
  0xd2   : > { %v536_v13 = vpop.f32.mrf.mxu0 }
  0xd3   : > { %555 = vmatmul.mubr.bf16.vlgmr.msra.gmra.mxu1 %v285_v12 }
  0xd4   : > { %v282_v14 = vpop.f32.mrf.mxu0 }
  0xd6   : > { %v537_v15 = vpop.f32.mrf.mxu0 }
 0x193   : > { %v391_v17 = vpop.f32.mrf.mxu1 }
 0x194   : > { %v392_v18 = vadd.f32 %v510_v16, %v391_v17 }
 0x195   : > { %v556_v19 = vpop.f32.mrf.mxu1 }
 0x196   : > { %397 = vst [vmem:[%s226_s24] sm:$0xff] %v392_v18  ;;  %v398_v20 = vrot.slane %v392_v18, 4  ;;  %v404_v21 = vmul.f32 %v392_v18, %v392_v18 }
 0x197   : > { %v394_v22 = vpop.f32.mrf.mxu1 }
 0x198   : > { %v399_v23 = vadd.f32 %v398_v20, %v392_v18  ;;  %v405_v24 = vrot.slane %v404_v21, 4 }
 0x199   : > { %v557_v25 = vpop.f32.mrf.mxu1 }
 0x19a   : > { %v400_v26 = vrot.slane %v399_v23, 2  ;;  %v406_v27 = vadd.f32 %v405_v24, %v404_v21 }
 0x19c   : > { %v401_v28 = vadd.f32 %v400_v26, %v399_v23  ;;  %v407_v29 = vrot.slane %v406_v27, 2 }
 0x19e   : > { %v402_v30 = vrot.slane %v401_v28, 1  ;;  %v408_v31 = vadd.f32 %v407_v29, %v406_v27 }
 0x1a0   : > { %v409_v32 = vrot.slane %v408_v31, 1  ;;  %v403_v33 = vadd.f32 %v402_v30, %v401_v28 }
 0x1a2   : > { %v410_v34 = vadd.f32 %v409_v32, %v408_v31 }
 0x1a4   : > { %v412_v35 = vsel %vm411_vm2, %v403_v33, %v410_v34 }
 0x1a5   : > { %v414_v36 = vsel %vm413_vm3, %v412_v35, 0.0 }
 0x1a6   : > { %415 = vst [vmem:[%s230_s26] sm:$0xff] %v414_v36 }
 0x1a7 PF: > { %s16_s18 = sadd.s32 1, %s583_s18  }
 0x1a8   : > { %p13_p4 = scmp.ge.s32.totalorder %s16_s18, 4  }
 0x1aa   :  { %15 = sbr.rel (!%p13_p4) target bundleno = 1 (0x1), region = 78 }

// kernel: simple_gcn_forward.3
= control target key start
LH: loop header
LB: loop body
LE: loop exit
PB: predicated region body
PF: predicated region fallthrough
CT: control target
= control target key end

     0   :  { %s690_s27 = smov 0   ;;  %s760_s0 = inlined_call_operand.vmem [shape: bf16[16,16], index: 0, kind: input, shape index: {}]   ;;  %s761_s1 = inlined_call_operand.vmem [shape: f32[16,128], index: 1, kind: input, shape index: {}]   ;;  %s762_s2 = inlined_call_operand.vmem [shape: f32[1,128], index: 2, kind: input, shape index: {}]   ;;  %s763_s3 = inlined_call_operand.vmem [shape: f32[1,128], index: 3, kind: input, shape index: {}]   ;;  %s764_s4 = inlined_call_operand.vmem [shape: f32[1,128], index: 4, kind: input, shape index: {}]   ;;  %s765_s5 = inlined_call_operand.vmem [shape: f32[1,128], index: 5, kind: input, shape index: {}]   ;;  %s766_s6 = inlined_call_operand.vmem [shape: bf16[128,128], index: 6, kind: input, shape index: {}]   ;;  %s767_s7 = inlined_call_operand.vmem [shape: f32[1,128], index: 7, kind: input, shape index: {}]   ;;  %s768_s8 = inlined_call_operand.vmem [shape: f32[16,128], index: 8, kind: output, shape index: {}]  }
   0x1 LB: > { %s556_s28 = sadd.s32 4294967295, %s641_s27   ;;  %p560_p0 = scmp.ge.s32.totalorder %s641_s27, 1  ;;  %s641_s27 = sphi %s690_s27, %s18_s27  }
   0x2   : > { %p261_p1 = scmp.lt.s32.totalorder %s641_s27, 3 }
   0x4   : > { %p262_p2 = pnand %p560_p0, %p261_p1 }
   0x5   : > { %p293_p3 = scmp.lt.s32.totalorder (!%p262_p2), %s556_s28, 1 }
   0x6   : > { %265 = sbr.rel (%p262_p2) target bundleno = 437 (0x1b5), region = 52 }
   0xb   : > { %v643_v0 = vmov 0.0   ;;  %v313_v1 = vld [vmem:[%s763_s3] sm:$0x1]  ;;  %vm644_vm0 = vmmov 0   ;;  %v625_v3 = vld [vmem:[%s766_s6 + $0x38] sm:$0xff]   ;;  %v626_v4 = vld [vmem:[%s766_s6 + $0x30] sm:$0xff]   ;;  %v317_v5 = vlaneseq }
   0xc   : > { %589 = vmatprep.subr.bf16.mxu0 %v643_v0  ;;  %591 = vmatprep.mubr.msk.bf16.mxu0 %vm644_vm0, %v643_v0  ;;  %v314_v2 = vadd.f32 1e-05, %v313_v1  ;;  %v627_v6 = vld [vmem:[%s766_s6 + $0x28] sm:$0xff]   ;;  %v628_v8 = vld [vmem:[%s766_s6 + $0x20] sm:$0xff]   ;;  %v629_v15 = vld [vmem:[%s766_s6 + $0x18] sm:$0xff]   ;;  %s770_s28 = smov (!%p293_p3, %s556_s28), 1 }
   0xd   : > { %595 = vmatprep.subr.bf16.mxu1 %v643_v0  ;;  %611 = vmatprep.mubr.msk.bf16.mxu1 %vm644_vm0, %v643_v0  ;;  %v318_v7 = vshrl.u32 %v317_v5, 7  ;;  %v302_v9 = vld [vmem:[%s761_s1] sm:$0xff]  ;;  %v303_v10 = vld [vmem:[%s761_s1 + $0x8] sm:$0xff]  ;;  %v630_v21 = vld [vmem:[%s766_s6 + $0x10] sm:$0xff]   ;;  %s561_s11 = sshll.u32 %s770_s28, 2  ;;  %vm346_vm1 = vcmask 130048  }
   0xe   : > { %633 = vrsqrt.f32 %v314_v2  ;;  %596 = vmatpush3.bf16.msra.mxu1 %v625_v3  ;;  %v563_v11 = vld [vmem:[%s762_s2] ss:$0 sm:$0xff]  ;;  %v631_v27 = vld [vmem:[%s766_s6 + $0x8] sm:$0xff]   ;;  %s296_s16 = scalar_lea.vmem %s760_s0, %s561_s11  ;;  %s562_s19 = sshll.u32 %s770_s28, 3 }
   0xf   : > { %597 = vmatprep.subr.bf16.mxu1 %v643_v0  ;;  %v319_v12 = vsub.s32 0, %v318_v7  ;;  %v311_v13 = vsub.f32 %v302_v9, %v563_v11  ;;  %v312_v14 = vsub.f32 %v303_v10, %v563_v11  ;;  %v564_v18 = vld [vmem:[%s764_s4] ss:$0 sm:$0xff]  ;;  %s300_s24 = scalar_lea.vmem %s768_s8, %s562_s19 }
  0x10   : > { %v565_v22 = vld [vmem:[%s765_s5] ss:$0 sm:$0xff] }
  0x11   : > { %v344_v31 = vld [vmem:[%s296_s16] sm:$0xf] }
  0x12   : > { %598 = vmatpush3.bf16.msra.mxu1 %v626_v4  ;;  %v632_v32 = vld [vmem:[%s766_s6] sm:$0xff]  }
  0x13   : > { %599 = vmatprep.subr.bf16.mxu1 %v643_v0  ;;  %v567_v38 = vld [vmem:[%s767_s7] ss:$0 sm:$0xff] }
  0x16   : > { %600 = vmatpush3.bf16.msra.mxu1 %v627_v6 }
  0x17   : > { %601 = vmatprep.subr.bf16.mxu1 %v643_v0 }
  0x1a   : > { %602 = vmatpush3.bf16.msra.mxu1 %v628_v8 }
  0x1b   : > { %v634_v16 = vpop.eup %633  ;;  %603 = vmatprep.subr.bf16.mxu1 %v643_v0 }
  0x1c   : > { %v320_v17 = vrot.slane %v634_v16, %v319_v12 }
  0x1e   : > { %v322_v19 = vmul.f32 %v320_v17, %v311_v13  ;;  %v323_v20 = vmul.f32 %v320_v17, %v312_v14  ;;  %604 = vmatpush3.bf16.msra.mxu1 %v629_v15 }
  0x1f   : > { %605 = vmatprep.subr.bf16.mxu1 %v643_v0 }
  0x20   : > { %v331_v23 = vmul.f32 %v564_v18, %v322_v19  ;;  %v332_v24 = vmul.f32 %v564_v18, %v323_v20 }
  0x22   : > { %v340_v25 = vadd.f32 %v565_v22, %v331_v23  ;;  %v341_v26 = vadd.f32 %v565_v22, %v332_v24  ;;  %606 = vmatpush3.bf16.msra.mxu1 %v630_v21 }
  0x23   : > { %607 = vmatprep.subr.bf16.mxu1 %v643_v0 }
  0x24   : > { %v342_v28 = vmax.f32 %v340_v25, 0.0  ;;  %v343_v29 = vmax.f32 %v341_v26, 0.0 }
  0x26   : > { %v345_v30 = vpack.c.bf16 %v343_v29, %v342_v28  ;;  %608 = vmatpush3.bf16.msra.mxu1 %v631_v27 }
  0x27   : > { %609 = vmatprep.subr.bf16.mxu1 %v643_v0 }
  0x28   : > { %590 = vmatpush3.bf16.msra.mxu0 %v345_v30 }
  0x2a   : > { %610 = vmatpush3.bf16.msra.mxu1 %v632_v32 }
  0x2b   : > { %592 = vmatmul.mubr.msk.bf16.vlgmr.msra.gmra.mxu0 %vm346_vm1, %v344_v31 }
  0xeb   : > { %v384_v33 = vpop.f32.mrf.mxu0 }
  0xec   : > { %v390_v34 = vpack.c.bf16 %v384_v33, %v384_v33 }
  0xed   : > { %v593_v35 = vpop.f32.mrf.mxu0 }
  0xee   : > { %612 = vmatmul.mubr.bf16.vlgmr.msra.gmra.mxu1 %v390_v34 }
  0xef   : > { %v387_v36 = vpop.f32.mrf.mxu0 }
  0xf1   : > { %v594_v37 = vpop.f32.mrf.mxu0 }
 0x1ae   : > { %v496_v39 = vpop.f32.mrf.mxu1 }
 0x1af   : > { %v497_v40 = vadd.f32 %v567_v38, %v496_v39 }
 0x1b0   : > { %v613_v41 = vpop.f32.mrf.mxu1 }
 0x1b1   : > { %502 = vst [vmem:[%s300_s24] sm:$0xff] %v497_v40 }
 0x1b2   : > { %v499_v42 = vpop.f32.mrf.mxu1 }
 0x1b4   : > { %v614_v43 = vpop.f32.mrf.mxu1 }
 0x1b5 PF: > { %s18_s27 = sadd.s32 1, %s641_s27  }
 0x1b6   : > { %p15_p4 = scmp.ge.s32.totalorder %s18_s27, 4  }
 0x1b8   :  { %17 = sbr.rel (!%p15_p4) target bundleno = 1 (0x1), region = 82 }

</bundles_post_ra>
